<compile_context>
chip_gen: v7x
topology: tpu7x:2x2x1
jax: 0.10.0
libtpu: 0.0.40
codegen_flags: <defaults>
</compile_context>

<pallas_src>
import jax
import jax.numpy as jnp
from jax.experimental import pallas as pl
from jax.experimental.pallas import tpu as pltpu


_MAX_BLOCK_BYTES = 4 * 1024 * 1024     # ~4 MiB per block; x4 double-buffers = 16 MiB
_LANE_CAP = 8192                       # keep the last dim a conventional lane width
_VMEM_LIMIT_BYTES = 48 * 1024 * 1024   # headroom under v7x's 64 MiB physical VMEM


def _copy_kernel(x_ref, o_ref):
    # Identity copy of one lane/sublane-dense tile through VMEM.
    o_ref[...] = x_ref[...]


def _plan_flat_copy(n_elems, itemsize):
    """Pick (R, L, TR): view the flat buffer as (R, L), copy in (TR, L) blocks.

    L is a 128-multiple divisor of n_elems (<= _LANE_CAP), preferring choices
    that make R = n_elems // L a multiple of 8 (full sublane occupancy).
    TR is chosen so a block is <= ~_MAX_BLOCK_BYTES and is a multiple of 8
    (or equals R), satisfying the (8, 128) tiling rule.
    Returns None when n_elems is not 128-aligned.
    """
    if n_elems % 128 != 0:
        return None
    lane_cap = min(_LANE_CAP, n_elems)
    lane_cap -= lane_cap % 128

    chosen = None
    fallback = None
    for cand in range(lane_cap, 127, -128):
        if n_elems % cand:
            continue
        if fallback is None:
            fallback = cand
        if (n_elems // cand) % 8 == 0:
            chosen = cand
            break
    L = chosen if chosen is not None else fallback  # 128 always divides -> never None
    R = n_elems // L

    max_tr = max(1, _MAX_BLOCK_BYTES // (L * itemsize))
    if R <= max_tr:
        TR = R                       # whole (small) array in one <=4 MiB block
    else:
        TR = None
        start = (max_tr // 8) * 8
        for cand in range(start, 7, -8):
            if R % cand == 0:
                TR = cand
                break
        if TR is None:
            TR = R                   # rare: no 8-multiple divisor fits the budget
    return R, L, TR


def unflatten_zero_copy(x, C, H, W):
    """Production path: a row-major view is metadata-only; no kernel needed."""
    B, F = x.shape
    assert F == C * H * W, "flattened feature dim must equal C*H*W"
    return jnp.reshape(x, (B, C, H, W))


def unflatten(x, C, H, W):
    """Pallas equivalent of UnFlatten(C, H, W).forward(x) for x of shape (B, C*H*W)."""
    B, F = x.shape
    assert F == C * H * W, "flattened feature dim must equal C*H*W"
    itemsize = jnp.dtype(x.dtype).itemsize

    cparams = pltpu.CompilerParams(
        dimension_semantics=("parallel",),
        vmem_limit_bytes=_VMEM_LIMIT_BYTES,
    )

    plan = _plan_flat_copy(B * F, itemsize)

    if plan is None:
        # Unaligned total element count: copy in the original (B, F) layout,
        # tiling the batch axis (when 8-aligned) so blocks stay byte-bounded.
        TB = B
        if B % 8 == 0:
            max_tb = max(1, _MAX_BLOCK_BYTES // (F * itemsize))
            start = (min(B, max_tb) // 8) * 8
            for cand in range(start, 7, -8):
                if B % cand == 0:
                    TB = cand
                    break
        flat = pl.pallas_call(
            _copy_kernel,
            out_shape=jax.ShapeDtypeStruct((B, F), x.dtype),
            grid=(B // TB,),
            in_specs=[pl.BlockSpec((TB, F), lambda i: (i, 0))],
            out_specs=pl.BlockSpec((TB, F), lambda i: (i, 0)),
            compiler_params=cparams,
        )(x)
        return jnp.reshape(flat, (B, C, H, W))

    R, L, TR = plan
    x2 = jnp.reshape(x, (R, L))          # row-major view of the flat buffer
    flat = pl.pallas_call(
        _copy_kernel,
        out_shape=jax.ShapeDtypeStruct((R, L), x.dtype),
        grid=(R // TR,),                  # TR always divides R -> no padding
        in_specs=[pl.BlockSpec((TR, L), lambda i: (i, 0))],
        out_specs=pl.BlockSpec((TR, L), lambda i: (i, 0)),
        compiler_params=cparams,
    )(x2)

    # Row-major reshape -- pure metadata, same semantics as torch .view().
    return jnp.reshape(flat, (B, C, H, W))


if __name__ == "__main__":
    B, C, H, W = 2, 4, 16, 16
    key = jax.random.PRNGKey(0)
    x = jax.random.normal(key, (B, C * H * W), dtype=jnp.float32)

    # Reference (exact row-major view semantics) and zero-copy path first.
    ref = jax.block_until_ready(jnp.reshape(x, (B, C, H, W)))
    y0 = jax.block_until_ready(unflatten_zero_copy(x, C, H, W))
    assert jnp.array_equal(y0, ref)

    # Pallas kernel path.
    y = unflatten(x, C, H, W)
    y = jax.block_until_ready(y)

    assert y.shape == (B, C, H, W)
    assert y.dtype == x.dtype
    assert jnp.array_equal(y, ref)

    print("KERNEL_OK")
</pallas_src>

<mosaic_0001>
module attributes {stable_mosaic.version = 11 : i64} {
  func.func @_copy_kernel(%arg0: i32, %arg1: memref<8x256xf32, #tpu.memory_space<vmem>>, %arg2: memref<8x256xf32, #tpu.memory_space<vmem>>) attributes {dimension_semantics = [#tpu.dimension_semantics<parallel>], iteration_bounds = array<i64: 1>, scalar_prefetch = 0 : i64, scratch_operands = 0 : i64, tpu.core_type = #tpu.core_type<tc>, window_params = [{transform_indices = @transform_0, window_bounds = array<i64: 8, 256>}, {transform_indices = @transform_1, window_bounds = array<i64: 8, 256>}]} {
    %c0 = arith.constant 0 : index
    %c0_0 = arith.constant 0 : index
    %0 = vector.load %arg1[%c0, %c0_0] : memref<8x256xf32, #tpu.memory_space<vmem>>, vector<8x256xf32>
    %c0_1 = arith.constant 0 : index
    %c0_2 = arith.constant 0 : index
    %1 = vector.load %arg2[%c0_1, %c0_2] : memref<8x256xf32, #tpu.memory_space<vmem>>, vector<8x256xf32>
    tpu.vector_store %arg2[%c0_1, %c0_2], %0 {strides = array<i32>} : memref<8x256xf32, #tpu.memory_space<vmem>>, vector<8x256xf32>,
    return
  }
  func.func @transform_0(%arg0: i32) -> (i32, i32) {
    %c0_i32 = arith.constant 0 : i32
    %c0_i32_0 = arith.constant 0 : i32
    return %arg0, %c0_i32 : i32, i32
  }
  func.func @transform_1(%arg0: i32) -> (i32, i32) {
    %c0_i32 = arith.constant 0 : i32
    %c0_i32_0 = arith.constant 0 : i32
    return %arg0, %c0_i32 : i32, i32
  }
}

</mosaic_0001>

<bundles_post_ra>
// kernel: tpu_custom_call.1
= control target key start
LH: loop header
LB: loop body
LE: loop exit
PB: predicated region body
PF: predicated region fallthrough
CT: control target
= control target key end

     0   :  { %6 = vsyncpa [#allocation3], 0  ;;  %s126_s0 = inlined_call_operand.hbm [shape: f32[8,256], index: 0, kind: input, shape index: {}]   ;;  %s127_s1 = inlined_call_operand.hbm [shape: f32[8,256], index: 1, kind: output, shape index: {}]  }
   0x1   :  { %7 = vsyncpa [#allocation4], 0  ;;  %s90_s6 = smov [#allocation2]   ;;  %s42_s10 = scalar_lea.hbm %s126_s0, 256 }
   0x2   :  { %s14_s7 = sshll.u32 %s90_s6, 4  ;;  %p43_p0 = scmp.ne.s32.totalorder %s126_s0, %s42_s10  ;;  %s15_s7 = int_to_ptr.vmem [resolvable:$true] %s14_s7 }
   0x3   :  { %p46_p1 = scmp.lt.u32.totalorder %s42_s10, %s126_s0 }
   0x5   :  { %p48_p2 = pnand %p46_p1, %p43_p0 }
   0x7   :  { %51 = shalt.err (!%p48_p2)
}
   0x8   :  { %s52_s15 = scalar_lea.vmem %s15_s7, 256  ;;  %p57_p4 = scmp.lt.s32.totalorder %s15_s7, %s15_s7 }
   0x9   :  { %p53_p3 = scmp.ne.s32.totalorder %s15_s7, %s52_s15  ;;  %p58_p5 = scmp.lt.s32.totalorder %s52_s15, %s52_s15 }
   0xb   :  { %p59_p6 = por %p58_p5, %p57_p4 }
   0xd   :  { %p60_p7 = pnand %p59_p6, %p53_p3 }
   0xf   :  { %63 = shalt.err (!%p60_p7)
}
  0x10   :  { %17 = dma.hbm_to_vmem [thread:$0]  %s126_s0, 256, %s15_s7, [#allocation3]  }
  0x11   :  { %86 = dma.done.wait [#allocation3], 256  }
  0x12   :  { %87 = vsyncadd [#allocation3], 4294967040  ;;  %s91_s18 = smov [#allocation5]   ;;  %v21_v0 = vld [vmem:[#allocation2] sm:$0xff]  ;;  %v22_v1 = vld [vmem:[#allocation2 + $0x8] sm:$0xff] }
  0x13   :  { %s31_s19 = sshll.u32 %s91_s18, 4  ;;  %23 = vst [vmem:[#allocation5] sm:$0xff] %v21_v0  ;;  %24 = vst [vmem:[#allocation5 + $0x8] sm:$0xff] %v22_v1  ;;  %s32_s19 = int_to_ptr.vmem [resolvable:$true] %s31_s19 }
  0x14   :  { %s64_s20 = scalar_lea.vmem %s32_s19, 256  ;;  %p69_p9 = scmp.lt.s32.totalorder %s32_s19, %s32_s19 }
  0x15   :  { %p65_p8 = scmp.ne.s32.totalorder %s32_s19, %s64_s20  ;;  %p70_p10 = scmp.lt.s32.totalorder %s64_s20, %s64_s20 }
  0x17   :  { %p71_p11 = por %p70_p10, %p69_p9 }
  0x19   :  { %p72_p12 = pnand %p71_p11, %p65_p8 }
  0x1b   :  { %75 = shalt.err (!%p72_p12)
}
  0x1c   :  { %s76_s0 = scalar_lea.hbm %s127_s1, 256 }
  0x1d   :  { %p77_p13 = scmp.ne.s32.totalorder %s127_s1, %s76_s0  ;;  %p80_p0 = scmp.lt.u32.totalorder %s76_s0, %s127_s1 }
  0x1f   :  { %p82_p1 = pnand %p80_p0, %p77_p13 }
  0x21   :  { %85 = shalt.err (!%p82_p1)
}
  0x22   :  { %34 = dma.vmem_to_hbm [thread:$0]  %s32_s19, 256, %s127_s1, [#allocation4]  }
  0x23   :  { %88 = dma.done.wait [#allocation4], 256  }
  0x24   :  { %89 = vsyncadd [#allocation4], 4294967040 }
  0x25   :  { %38 = vsyncpa [#allocation3], 1 }
  0x26   :  { %39 = vsyncpa [#allocation4], 1 }

</bundles_post_ra>
